<compile_context>
chip_gen: v7x
topology: tpu7x:2x2x1
jax: 0.10.0
libtpu: 0.0.40
codegen_flags: <defaults>
</compile_context>

<pallas_src>
import math
import functools

import numpy as np

import jax
import jax.numpy as jnp
from jax.experimental import pallas as pl
from jax.experimental.pallas import tpu as pltpu


def _cdiv(a: int, b: int) -> int:
    return -(-a // b)


def _round_up(a: int, b: int) -> int:
    return _cdiv(a, b) * b


def _num_tensorcores_per_chip() -> int:
    """2 on v7x (megacore sharding pays off), else 1.  Safe fallback: 1."""
    try:
        kind = jax.devices()[0].device_kind.lower()
    except Exception:
        return 1
    return 2 if ("v7" in kind or "7x" in kind) else 1


def _plan_tiles(rows: int, lane_width: int, budget_bytes: int, num_tc: int):
    """Pick (tile_rows, n_blocks) for a (rows, lane_width) f32 output.

    - Single full-array block whenever it fits the VMEM budget and there is no
      multi-TensorCore split to exploit (no masking, no extra grid-step overhead).
    - Otherwise blocks are multiples of 8 rows, sized so the per-TC halves (v7x) or
      the whole row range (v5e/v6e) are split into (near-)equal blocks.
    """
    bytes_per_row = lane_width * 4
    cap = max(8, (budget_bytes // bytes_per_row) // 8 * 8)   # rows/block, multiple of 8

    want_split = num_tc >= 2 and rows >= 256   # megacore split only with real work
    if rows <= cap and not want_split:
        return rows, 1                          # one full-array block

    parts = num_tc if want_split else 1
    per_part = _cdiv(rows, parts)
    blocks_per_part = max(1, _cdiv(per_part, cap))
    tr = min(cap, _round_up(_cdiv(per_part, blocks_per_part), 8))
    return tr, _cdiv(rows, tr)


def _pe_kernel(const_ref, o_ref, *, tile_rows: int, pack: int):
    """One (tile_rows, lane_width) lane-packed tile of the PE table.

    const_ref rows: 0 = lane->position offset, 1 = inv_freq(col), 2 = phase (0 or pi/2).
    angle = (row*pack + lane_off) * inv_freq + phase ;  output = sin(angle).
    """
    blk = pl.program_id(0)

    c = const_ref[...]            # (8, W) — rows 0..2 carry data
    inv_freq = c[1:2, :]          # (1, W)
    phase = c[2:3, :]             # (1, W)

    row = jax.lax.broadcasted_iota(jnp.int32, o_ref.shape, 0) + blk * tile_rows
    pos = row.astype(jnp.float32)
    if pack > 1:
        pos = pos * jnp.float32(pack) + c[0:1, :]   # lane -> absolute position (exact in f32)
    o_ref[...] = jnp.sin(pos * inv_freq + phase)    # single EUP transcendental per element


def positional_encoding(length: int, d_model: int = 512, *,
                        vmem_tile_bytes: int = 4 * 1024 * 1024):
    """Returns the PE table of shape (1, length, d_model) float32 (== torch forward)."""
    assert d_model % 2 == 0, "d_model must be even (as in the PyTorch module)"
    assert length >= 1

    # Lane packing: keep the stored last dim a multiple of 128 for every d_model.
    pack = 1 if d_model % 128 == 0 else 128 // math.gcd(d_model, 128)
    lane_width = pack * d_model
    # Packed-row bookkeeping: row r, lane l -> pos = r*pack + l//d_model, col = l%d_model
    rows = _cdiv(length, pack)

    tr, n_blocks = _plan_tiles(rows, lane_width, vmem_tile_bytes,
                               _num_tensorcores_per_chip())
    # Largest block is <= 4 MiB (8 MiB double-buffered) + an (8, W) const tile:
    # safely under the scoped-VMEM defaults on v5e/v6e/v7x, no vmem_limit override needed.

    # Trace-time per-lane constants (float64 on host, cast once to f32).
    lane = np.arange(lane_width)
    col = lane % d_model
    two_i = (col // 2) * 2
    consts = np.zeros((8, lane_width), dtype=np.float32)     # pad sublanes to 8
    consts[0] = (lane // d_model).astype(np.float64)                              # lane_off
    consts[1] = np.exp(two_i.astype(np.float64) * (-math.log(10000.0) / d_model)) # inv_freq
    consts[2] = np.where(col % 2 == 0, 0.0, math.pi / 2.0)                        # phase
    consts = jnp.asarray(consts)

    pe_packed = pl.pallas_call(
        functools.partial(_pe_kernel, tile_rows=tr, pack=pack),
        out_shape=jax.ShapeDtypeStruct((rows, lane_width), jnp.float32),
        grid=(n_blocks,),
        in_specs=[pl.BlockSpec((8, lane_width), lambda i: (0, 0))],
        out_specs=pl.BlockSpec((tr, lane_width), lambda i: (i, 0)),
        compiler_params=pltpu.CompilerParams(
            dimension_semantics=("parallel",)),
    )(consts)

    if pack == 1:
        pe = pe_packed                                   # exactly (length, d_model)
    else:
        pe = pe_packed.reshape(rows * pack, d_model)     # row-major unpack: free
        if rows * pack != length:
            # Residual slice only when d_model % 128 != 0 and length % pack != 0
            # (small-d_model tables), trimming at most pack-1 rows.
            pe = pe[:length]
    return pe[None]  # (1, length, d_model)


def _reference_pe(length: int, d_model: int):
    """Plain-JAX replica of the PyTorch buffer construction, sliced to `length`."""
    position = jnp.arange(length, dtype=jnp.float32)[:, None]
    div_term = jnp.exp(jnp.arange(0, d_model, 2, dtype=jnp.float32)
                       * (-math.log(10000.0) / d_model))
    pe = jnp.zeros((length, d_model), jnp.float32)
    pe = pe.at[:, 0::2].set(jnp.sin(position * div_term))
    pe = pe.at[:, 1::2].set(jnp.cos(position * div_term))
    return pe[None]


if __name__ == "__main__":
    # forward() takes only an integer length; no tensor inputs.
    # PRNGKey kept for protocol consistency (unused — module has no random params).
    _ = jax.random.PRNGKey(0)

    cases = [
        # (length, d_model, vmem_tile_bytes override)
        (16, 32, None),        # pack=4, exact packed length, single block
        (40, 32, None),        # pack=4, rows=10 -> full-array block (not mult of 8)
        (19, 64, None),        # pack=2, odd length -> residual slice path
        (23, 96, None),        # 128 % d_model != 0 -> lcm packing (pack=4, lanes=384)
        (37, 128, None),       # pack=1, exact (length, d_model) output, no slice
        (120, 128, 32 * 1024), # tiny budget -> 2 blocks + masked partial tail
        (64, 512, None),       # default d_model
    ]
    for length, d_model, budget in cases:
        kwargs = {} if budget is None else dict(vmem_tile_bytes=budget)
        out = positional_encoding(length, d_model=d_model, **kwargs)
        out = jax.block_until_ready(out)

        ref = _reference_pe(length, d_model)
        assert out.shape == (1, length, d_model), (out.shape, length, d_model)
        assert out.dtype == jnp.float32
        assert jnp.allclose(out, ref, atol=1e-4, rtol=1e-5), (length, d_model)

    print("KERNEL_OK")
</pallas_src>

<mosaic_0001>
module attributes {stable_mosaic.version = 11 : i64} {
  func.func @_pe_kernel(%arg0: i32, %arg1: memref<8x128xf32, #tpu.memory_space<vmem>>, %arg2: memref<4x128xf32, #tpu.memory_space<vmem>>) attributes {dimension_semantics = [#tpu.dimension_semantics<parallel>], iteration_bounds = array<i64: 1>, scalar_prefetch = 0 : i64, scratch_operands = 0 : i64, tpu.core_type = #tpu.core_type<tc>, window_params = [{pipeline_mode = #tpu.pipeline_mode<synchronous>, transform_indices = @transform_0, window_bounds = array<i64: 8, 128>}, {transform_indices = @transform_1, window_bounds = array<i64: 4, 128>}]} {
    %c0 = arith.constant 0 : index
    %c0_0 = arith.constant 0 : index
    %0 = vector.load %arg1[%c0, %c0_0] : memref<8x128xf32, #tpu.memory_space<vmem>>, vector<8x128xf32>
    %1 = vector.extract_strided_slice %0 {offsets = [1, 0], sizes = [1, 128], strides = [1, 1]} : vector<8x128xf32> to vector<1x128xf32>
    %2 = vector.extract_strided_slice %0 {offsets = [2, 0], sizes = [1, 128], strides = [1, 1]} : vector<8x128xf32> to vector<1x128xf32>
    %3 = tpu.iota {dimensions = array<i32: 0>} : vector<4x128xi32>
    %c4_i32 = arith.constant 4 : i32
    %4 = arith.muli %arg0, %c4_i32 : i32
    %5 = vector.broadcast %4 : i32 to vector<4x128xi32>
    %6 = arith.addi %3, %5 : vector<4x128xi32>
    %7 = arith.sitofp %6 : vector<4x128xi32> to vector<4x128xf32>
    %cst = arith.constant 4.000000e+00 : f32
    %8 = vector.broadcast %cst : f32 to vector<4x128xf32>
    %9 = arith.mulf %7, %8 : vector<4x128xf32>
    %10 = vector.extract_strided_slice %0 {offsets = [0, 0], sizes = [1, 128], strides = [1, 1]} : vector<8x128xf32> to vector<1x128xf32>
    %11 = vector.broadcast %10 : vector<1x128xf32> to vector<4x128xf32>
    %12 = arith.addf %9, %11 : vector<4x128xf32>
    %13 = vector.broadcast %1 : vector<1x128xf32> to vector<4x128xf32>
    %14 = arith.mulf %12, %13 : vector<4x128xf32>
    %15 = vector.broadcast %2 : vector<1x128xf32> to vector<4x128xf32>
    %16 = arith.addf %14, %15 : vector<4x128xf32>
    %17 = math.sin %16 : vector<4x128xf32>
    %c0_1 = arith.constant 0 : index
    %c0_2 = arith.constant 0 : index
    %18 = vector.load %arg2[%c0_1, %c0_2] : memref<4x128xf32, #tpu.memory_space<vmem>>, vector<4x128xf32>
    tpu.vector_store %arg2[%c0_1, %c0_2], %17 {strides = array<i32>} : memref<4x128xf32, #tpu.memory_space<vmem>>, vector<4x128xf32>,
    return
  }
  func.func @transform_0(%arg0: i32) -> (i32, i32) {
    %c0_i32 = arith.constant 0 : i32
    %c0_i32_0 = arith.constant 0 : i32
    %c0_i32_1 = arith.constant 0 : i32
    return %c0_i32, %c0_i32_0 : i32, i32
  }
  func.func @transform_1(%arg0: i32) -> (i32, i32) {
    %c0_i32 = arith.constant 0 : i32
    %c0_i32_0 = arith.constant 0 : i32
    return %arg0, %c0_i32 : i32, i32
  }
}

</mosaic_0001>

<bundles_post_ra>
// kernel: tpu_custom_call.1
= control target key start
LH: loop header
LB: loop body
LE: loop exit
PB: predicated region body
PF: predicated region fallthrough
CT: control target
= control target key end

     0   :  { %6 = vsyncpa [#allocation3], 0  ;;  %s295_s0 = inlined_call_operand.hbm [shape: f32[8,128], index: 0, kind: input, shape index: {}]   ;;  %s296_s1 = inlined_call_operand.hbm [shape: f32[4,128], index: 1, kind: output, shape index: {}]  }
   0x1   :  { %7 = vsyncpa [#allocation4], 0  ;;  %s232_s6 = smov [#allocation2]   ;;  %s184_s10 = scalar_lea.hbm %s295_s0, 128 }
   0x2   :  { %s14_s7 = sshll.u32 %s232_s6, 4  ;;  %p185_p0 = scmp.ne.s32.totalorder %s295_s0, %s184_s10  ;;  %s15_s7 = int_to_ptr.vmem [resolvable:$true] %s14_s7 }
   0x3   :  { %p188_p1 = scmp.lt.u32.totalorder %s184_s10, %s295_s0 }
   0x5   :  { %p190_p2 = pnand %p188_p1, %p185_p0 }
   0x7   :  { %193 = shalt.err (!%p190_p2)
}
   0x8   :  { %s194_s15 = scalar_lea.vmem %s15_s7, 128  ;;  %p199_p4 = scmp.lt.s32.totalorder %s15_s7, %s15_s7 }
   0x9   :  { %p195_p3 = scmp.ne.s32.totalorder %s15_s7, %s194_s15  ;;  %p200_p5 = scmp.lt.s32.totalorder %s194_s15, %s194_s15 }
   0xb   :  { %p201_p6 = por %p200_p5, %p199_p4 }
   0xd   :  { %p202_p7 = pnand %p201_p6, %p195_p3 }
   0xf   :  { %205 = shalt.err (!%p202_p7)
}
  0x10   :  { %17 = dma.hbm_to_vmem [thread:$0]  %s295_s0, 128, %s15_s7, [#allocation3]  }
  0x11   :  { %228 = dma.done.wait [#allocation3], 128  }
  0x12   :  { %229 = vsyncadd [#allocation3], 4294967168  ;;  %v22_v0 = vlaneseq  ;;  %v21_v7 = vld [vmem:[#allocation2] sm:$0xff]  ;;  %v233_v25 = vmov 683565275   ;;  %s239_s0 = smov [#allocation5]  }
  0x13   :  { %v234_v27 = vmov 2475754826   ;;  %v235_v29 = vmov 2131351028   ;;  %v236_v31 = vmov 2102212464  }
  0x14   :  { %v23_v1 = vshrl.u32 %v22_v0, 7  ;;  %v237_v33 = vmov 920167782   ;;  %v238_v40 = vmov 1326507024   ;;  %s155_s18 = sshll.u32 %s239_s0, 4  ;;  %s156_s18 = int_to_ptr.vmem [resolvable:$true] %s155_s18 }
  0x15   :  { %s206_s19 = scalar_lea.vmem %s156_s18, 64  ;;  %p211_p9 = scmp.lt.s32.totalorder %s156_s18, %s156_s18 }
  0x16   :  { %v31_v2 = vsub.s32 0, %v23_v1  ;;  %v36_v3 = vsub.s32 1, %v23_v1  ;;  %v27_v4 = vcvt.s32.f32 %v23_v1  ;;  %v41_v6 = vsub.s32 2, %v23_v1  ;;  %p207_p8 = scmp.ne.s32.totalorder %s156_s18, %s206_s19  ;;  %p212_p10 = scmp.lt.s32.totalorder %s206_s19, %s206_s19 }
  0x18   :  { %v28_v5 = vmul.f32 4.0, %v27_v4  ;;  %v32_v8 = vrot.slane %v21_v7, %v31_v2  ;;  %v37_v9 = vrot.slane %v21_v7, %v36_v3  ;;  %v42_v11 = vrot.slane %v21_v7, %v41_v6  ;;  %p213_p11 = por %p212_p10, %p211_p9 }
  0x1a   :  { %v33_v10 = vadd.f32 %v32_v8, %v28_v5  ;;  %p214_p12 = pnand %p213_p11, %p207_p8 }
  0x1c   :  { %v38_v12 = vmul.f32 %v37_v9, %v33_v10 }
  0x1e   :  { %v262_v13 = vadd.f32 %v42_v11, %v38_v12 }
  0x20   :  { %v47_v14 = vand.u32 2139095040, %v262_v13  ;;  %v44_v16 = vand.u32 2147483647, %v262_v13  ;;  %vm46_vm7 = vcmp.lt.s32.totalorder %v262_v13, 0  ;;  %vm136_vm12 = vweird.f32 %v262_v13 }
  0x22   :  { %v48_v15 = vshrl.u32 %v47_v14, 23  ;;  %v51_v19 = vand.u32 8388607, %v44_v16  ;;  %vm45_vm8 = vcmp.le.f32.partialorder %v44_v16, 0.7853982 }
  0x24   :  { %v164_v17 = vadd.s32 4294967169, %v48_v15  ;;  %v52_v22 = vor.u32 8388608, %v51_v19 }
  0x26   :  { %v54_v18 = vadd.s32 1, %v164_v17  ;;  %v92_v42 = vshll.u32 %v52_v22, 8 }
  0x28   :  { %vm55_vm0 = vcmp.gt.s32.totalorder %v54_v18, 0 }
  0x29   :  { %v56_v20 = vsel %vm55_vm0, %v54_v18, 0 }
  0x2a   :  { %v58_v21 = vand.u32 31, %v56_v20  ;;  %v57_v23 = vshrl.u32 %v56_v20, 5 }
  0x2c   :  { %v59_v24 = vsub.s32 32, %v58_v21  ;;  %v61_v26 = vshll.u32 %v233_v25, %v58_v21  ;;  %v64_v28 = vshll.u32 %v234_v27, %v58_v21  ;;  %v67_v30 = vshll.u32 %v235_v29, %v58_v21 }
  0x2d   :  { %v70_v32 = vshll.u32 %v236_v31, %v58_v21  ;;  %v73_v34 = vshll.u32 %v237_v33, %v58_v21  ;;  %vm76_vm1 = vcmp.lt.s32.totalorder %v57_v23, 1  ;;  %vm79_vm2 = vcmp.lt.s32.totalorder %v57_v23, 4 }
  0x2e   :  { %v60_v35 = vshrl.u32 %v233_v25, %v59_v24  ;;  %v62_v36 = vshrl.u32 %v234_v27, %v59_v24  ;;  %v65_v37 = vshrl.u32 %v235_v29, %v59_v24  ;;  %v68_v38 = vshrl.u32 %v236_v31, %v59_v24 }
  0x2f   :  { %v71_v39 = vshrl.u32 %v237_v33, %v59_v24  ;;  %v74_v41 = vshrl.u32 %v238_v40, %v59_v24  ;;  %vm77_vm3 = vcmp.lt.s32.totalorder %v57_v23, 2  ;;  %vm78_vm4 = vcmp.lt.s32.totalorder %v57_v23, 3 }
  0x30   :  { %v63_v43 = vor.u32 %v62_v36, %v61_v26  ;;  %v66_v44 = vor.u32 %v65_v37, %v64_v28  ;;  %v69_v45 = vor.u32 %v68_v38, %v67_v30 }
  0x31   :  { %v72_v46 = vor.u32 %v71_v39, %v70_v32  ;;  %v75_v47 = vor.u32 %v74_v41, %v73_v34 }
  0x32   :  { %v80_v48 = vsel %vm76_vm1, %v60_v35, %v63_v43  ;;  %v81_v49 = vsel %vm79_vm2, %v69_v45, 2102212464  ;;  %v84_v50 = vsel %vm76_vm1, %v63_v43, %v66_v44  ;;  %v88_v51 = vsel %vm76_vm1, %v66_v44, %v69_v45 }
  0x33   :  { %v82_v52 = vsel %vm78_vm4, %v66_v44, %v81_v49  ;;  %v85_v53 = vsel %vm79_vm2, %v72_v46, 920167782  ;;  %v89_v54 = vsel %vm79_vm2, %v75_v47, 1326507024 }
  0x34   :  { %v86_v55 = vsel %vm78_vm4, %v69_v45, %v85_v53  ;;  %v90_v56 = vsel %vm78_vm4, %v72_v46, %v89_v54  ;;  %v83_v57 = vsel %vm77_vm3, %v80_v48, %v82_v52 }
  0x35   :  { %v87_v58 = vsel %vm77_vm3, %v84_v50, %v86_v55  ;;  %v91_v59 = vsel %vm77_vm3, %v88_v51, %v90_v56  ;;  %v99_v0 = vmul.u32 %v92_v42, %v83_v57 }
  0x36   :  { %v268_v60 = vmul.u32.u64.low %v92_v42, %v91_v59  ;;  %v269_v61 = vmul.u32.u64.high %v92_v42, %v91_v59, %v268_v60  ;;  %v271_v62 = vmul.u32.u64.low %v92_v42, %v87_v58  ;;  %v272_v63 = vmul.u32.u64.high %v92_v42, %v87_v58, %v271_v62 }
  0x38   :  { %vm101_vm5 = vc.u32 %v269_v61, %v271_v62  ;;  %v102_v1 = vadd.s32 1, %v272_v63  ;;  %v100_v12 = vadd.s32 %v271_v62, %v269_v61 }
  0x3a   :  { %v103_v2 = vsel %vm101_vm5, %v102_v1, %v272_v63 }
  0x3b   :  { %v104_v3 = vadd.s32 %v103_v2, %v99_v0 }
  0x3d   :  { %v105_v4 = vadd.s32 536870912, %v104_v3 }
  0x3f   :  { %v106_v5 = vshrl.u32 %v105_v4, 30 }
  0x41   :  { %v107_v6 = vshll.u32 %v106_v5, 30  ;;  %v130_v26 = vsub.s32 4, %v106_v5 }
  0x43   :  { %v108_v7 = vsub.s32 %v104_v3, %v107_v6  ;;  %v131_v29 = vsel %vm46_vm7, %v130_v26, %v106_v5 }
  0x44   :  { %v133_v32 = vsel %vm45_vm8, 0, %v131_v29 }
  0x45   :  { %v110_v8 = vsub.s32 0, %v108_v7  ;;  %v137_v33 = vadd.s32 3, %v133_v32 }
  0x47   :  { %v165_v9 = vmin.u32 %v110_v8, %v108_v7  ;;  %v138_v34 = vand.u32 3, %v137_v33 }
  0x49   :  { %v112_v10 = vclz %v165_v9  ;;  %vm143_vm9 = vcmp.eq.s32.totalorder %v138_v34, 2  ;;  %vm140_vm10 = vcmp.eq.s32.totalorder %v138_v34, 0  ;;  %vm139_vm11 = vcmp.lt.s32.totalorder %v138_v34, 2 }
  0x4b   :  { %v166_v11 = vadd.s32 4294967294, %v112_v10 }
  0x4d   :  { %vm167_vm6 = vcmp.lt.s32.totalorder %v166_v11, 0 }
  0x4e   :  { %v115_v14 = vsel %vm167_vm6, 0, %v166_v11 }
  0x4f   :  { %v116_v15 = vsub.s32 32, %v115_v14  ;;  %v117_v17 = vshll.u32 %v108_v7, %v115_v14  ;;  %v120_v18 = vsub.s32 4294967266, %v115_v14 }
  0x51   :  { %v118_v19 = vshrl.u32 %v100_v12, %v116_v15  ;;  %v121_v20 = vadd.s32 127, %v120_v18 }
  0x53   :  { %v119_v21 = vor.u32 %v118_v19, %v117_v17  ;;  %v122_v22 = vshll.u32 %v121_v20, 23 }
  0x55   :  { %v123_v23 = vor.u32 4788187, %v122_v22  ;;  %v126_v24 = vcvt.s32.f32 %v119_v21 }
  0x57   :  { %v124_v25 = vand.u32 2147483647, %v123_v23 }
  0x59   :  { %v127_v27 = vmul.f32 %v126_v24, %v124_v25 }
  0x5b   :  { %v128_v28 = vxor.u32 2147483648, %v127_v27 }
  0x5d   :  { %v129_v30 = vsel %vm46_vm7, %v128_v28, %v127_v27 }
  0x5e   :  { %v132_v31 = vsel %vm45_vm8, %v262_v13, %v129_v30 }
  0x5f   :  { %180 = vcosq.f32 %v132_v31 }
  0x60   :  { %182 = vsinq.f32 %v132_v31 }
  0x69   :  { %v181_v35 = vpop.eup %180 }
  0x6a   :  { %v183_v36 = vpop.eup %182  ;;  %v144_v37 = vxor.u32 2147483648, %v181_v35 }
  0x6b   :  { %v141_v38 = vxor.u32 2147483648, %v183_v36 }
  0x6c   :  { %v145_v16 = vsel %vm143_vm9, %v144_v37, %v183_v36 }
  0x6d   :  { %v142_v39 = vsel %vm140_vm10, %v181_v35, %v141_v38 }
  0x6e   :  { %v146_v40 = vsel %vm139_vm11, %v142_v39, %v145_v16 }
  0x6f   :  { %v147_v41 = vsel %vm136_vm12, nan, %v146_v40 }
  0x70   :  { %148 = vst [vmem:[#allocation5] sm:$0xf] %v147_v41 }
  0x71   :  { %217 = shalt.err (!%p214_p12)
}
  0x72   :  { %s218_s22 = scalar_lea.hbm %s296_s1, 64 }
  0x73   :  { %p219_p13 = scmp.ne.s32.totalorder %s296_s1, %s218_s22  ;;  %p222_p0 = scmp.lt.u32.totalorder %s218_s22, %s296_s1 }
  0x75   :  { %p224_p1 = pnand %p222_p0, %p219_p13 }
  0x77   :  { %227 = shalt.err (!%p224_p1)
}
  0x78   :  { %158 = dma.vmem_to_hbm [thread:$0]  %s156_s18, 64, %s296_s1, [#allocation4]  }
  0x79   :  { %230 = dma.done.wait [#allocation4], 64  }
  0x7a   :  { %231 = vsyncadd [#allocation4], 4294967232 }
  0x7b   :  { %162 = vsyncpa [#allocation3], 1 }
  0x7c   :  { %163 = vsyncpa [#allocation4], 1 }

</bundles_post_ra>
